<compile_context>
chip_gen: v6e
topology: v6e:2x2x1
jax: 0.10.0
libtpu: 0.0.40
codegen_flags: <defaults>
</compile_context>

<pallas_src>
import functools

import jax
import jax.numpy as jnp
from jax import lax
from jax.experimental import pallas as pl
from jax.experimental.pallas import tpu as pltpu


def _round_up(x, m):
    return ((x + m - 1) // m) * m


# ----------------------------------------------------------------------------- kernel
def deeponet_kernel(beta_ref, y_ref, w_ref, bcol_ref, pbias_ref, out_ref, *,
                    h, sensor_dim, in_dim, n_layers):
    """Fused branch+trunk DeepONet forward on one batch tile.

    beta_ref : (T, sensor_dim) f32   natural-layout branch input tile
    y_ref    : (T, in_dim)     f32   natural-layout trunk input tile
    w_ref    : (n_layers*fa, wcols) bf16  fused block-diagonal weights (resident)
    bcol_ref : (fa, n_layers)  f32   per-layer bias columns (resident)
    pbias_ref: (1, 1)          f32   scalar output bias p['bias'] (SMEM)
    out_ref  : (1, 1, T)       f32   lane-dense output row
    Activations run transposed: (features=fa, batch=T) with the batch on lanes.
    """
    fa = 2 * h
    f32 = jnp.float32
    bf16 = jnp.bfloat16
    nt = (((1,), (1,)), ((), ()))      # contract both operands' last dims: A @ B^T

    # ---- layer 0: branch rows get Wb0 @ beta^T, trunk rows get Wt0 @ y^T (one fused band)
    acc = lax.dot_general(w_ref[0:fa, 0:sensor_dim], beta_ref[...].astype(bf16),
                          nt, preferred_element_type=f32)
    acc = acc + lax.dot_general(w_ref[0:fa, sensor_dim:sensor_dim + in_dim],
                                y_ref[...].astype(bf16),
                                nt, preferred_element_type=f32)
    z = jnp.maximum(acc + bcol_ref[:, 0:1], 0.0).astype(bf16)            # (fa, T)

    # ---- hidden layers: block-diagonal (fa, fa) MXU matmul, bias + ReLU on the VPU in f32
    for l in range(1, n_layers - 1):
        acc = jnp.dot(w_ref[l * fa:(l + 1) * fa, 0:fa], z, preferred_element_type=f32)
        z = jnp.maximum(acc + bcol_ref[:, l:l + 1], 0.0).astype(bf16)

    # ---- last layer: single fused matmul, kept in f32 for the head
    l = n_layers - 1
    acc = jnp.dot(w_ref[l * fa:(l + 1) * fa, 0:fa], z, preferred_element_type=f32)
    z = jnp.maximum(acc + bcol_ref[:, l:l + 1], 0.0)                     # (fa, T) f32

    # ---- head: per-sample <branch, trunk> dot = sublane reduce over h rows -> (1, T) row
    out_ref[0, :, :] = (jnp.sum(z[0:h, :] * z[h:fa, :], axis=0, keepdims=True)
                        + pbias_ref[0, 0])


# ------------------------------------------------------------------- parameter packing
def pack_params(params, sensor_dim, in_dim, h_dim):
    """Pack the 10 nn.Linear layers ((out,in) weights) into fused block-diagonal blobs.

    Weight-blob rows l*fa:(l+1)*fa hold layer l; the branch net occupies rows/cols 0:h
    and the trunk net rows/cols h:2h (layer-0 columns are [beta-features | y-features]).
    Biases live in a separate f32 (fa, n_layers) column blob added on the VPU in-kernel.
    """
    fa = 2 * h_dim
    n_layers = len(params["branch"])
    wcols = max(fa, sensor_dim + in_dim)

    w = jnp.zeros((n_layers * fa, wcols), jnp.float32)
    b = jnp.zeros((fa, n_layers), jnp.float32)

    (wb, bb), (wt, bt) = params["branch"][0], params["trunk"][0]
    w = w.at[0:h_dim, 0:sensor_dim].set(wb)
    w = w.at[h_dim:fa, sensor_dim:sensor_dim + in_dim].set(wt)
    b = b.at[0:h_dim, 0].set(bb)
    b = b.at[h_dim:fa, 0].set(bt)

    for l in range(1, n_layers):
        (wb, bb), (wt, bt) = params["branch"][l], params["trunk"][l]
        r = l * fa
        w = w.at[r:r + h_dim, 0:h_dim].set(wb)
        w = w.at[r + h_dim:r + fa, h_dim:fa].set(wt)
        b = b.at[0:h_dim, l].set(bb)
        b = b.at[h_dim:fa, l].set(bt)

    return w.astype(jnp.bfloat16), b


# -------------------------------------------------------------------------- entry point
def _pick_tile_b(n, cap=2048):
    """Lane-tile size: as large as useful (<= cap), but >= 2 grid steps once n >= 256 so
    both v7x TensorCores get a 'parallel' step.  VMEM is a non-issue at these sizes."""
    n128 = _round_up(max(n, 1), 128)
    if n128 <= 128:
        return 128
    return max(128, min(cap, _round_up(n128 // 2, 128)))


def deeponet_forward(beta, y, params, *, tile_cap=2048):
    n, sensor_dim = beta.shape
    n_y, in_dim = y.shape
    assert n == n_y
    h_dim = params["branch"][0][0].shape[0]
    n_layers = len(params["branch"])

    w_blob, b_blob = pack_params(params, sensor_dim, in_dim, h_dim)
    pbias = params["bias"].reshape(1, 1).astype(jnp.float32)

    tile_b = _pick_tile_b(n, tile_cap)
    num_blocks = pl.cdiv(n, tile_b)          # partial last block handled by Pallas

    kernel = functools.partial(deeponet_kernel, h=h_dim, sensor_dim=sensor_dim,
                               in_dim=in_dim, n_layers=n_layers)

    out = pl.pallas_call(
        kernel,
        out_shape=jax.ShapeDtypeStruct((num_blocks, 1, tile_b), jnp.float32),
        grid_spec=pltpu.PrefetchScalarGridSpec(
            num_scalar_prefetch=0,
            grid=(num_blocks,),
            in_specs=[
                pl.BlockSpec((tile_b, sensor_dim), lambda i: (i, 0)),   # batch-tiled beta
                pl.BlockSpec((tile_b, in_dim), lambda i: (i, 0)),       # batch-tiled y
                pl.BlockSpec(w_blob.shape, lambda i: (0, 0)),           # resident weights
                pl.BlockSpec(b_blob.shape, lambda i: (0, 0)),           # resident biases
                pl.BlockSpec(memory_space=pltpu.MemorySpace.SMEM),      # scalar p['bias']
            ],
            out_specs=pl.BlockSpec((1, 1, tile_b), lambda i: (i, 0, 0)),
        ),
        compiler_params=pltpu.CompilerParams(
            dimension_semantics=("parallel",)),
    )(beta.astype(jnp.float32), y.astype(jnp.float32), w_blob, b_blob, pbias)

    return out.reshape(num_blocks * tile_b, 1)[:n]


# ----------------------------------------------------------------------- init / reference
def init_params(key, sensor_dim, in_dim, h_dim):
    """nn.Linear-style params: W is (out_features, in_features), b is (out_features,)."""
    def linear(k, fan_in, fan_out):
        kw, kb = jax.random.split(k)
        bound = 1.0 / (fan_in ** 0.5)
        w = jax.random.uniform(kw, (fan_out, fan_in), jnp.float32, -bound, bound)
        b = jax.random.uniform(kb, (fan_out,), jnp.float32, -bound, bound)
        return w, b

    keys = jax.random.split(key, 10)
    branch = [linear(keys[0], sensor_dim, h_dim)] + \
             [linear(keys[1 + i], h_dim, h_dim) for i in range(4)]
    trunk = [linear(keys[5], in_dim, h_dim)] + \
            [linear(keys[6 + i], h_dim, h_dim) for i in range(4)]
    # self.p['bias'] = zeros([1]) in the PyTorch module
    return {"branch": branch, "trunk": trunk, "bias": jnp.zeros((1,), jnp.float32)}


def reference_forward(beta, y, params):
    """Pure-f32 JAX reference mirroring the PyTorch module."""
    hp = lax.Precision.HIGHEST
    b_act = beta
    for w, b in params["branch"]:
        b_act = jnp.maximum(jnp.dot(b_act, w.T, precision=hp) + b, 0.0)
    t_act = y
    for w, b in params["trunk"]:
        t_act = jnp.maximum(jnp.dot(t_act, w.T, precision=hp) + b, 0.0)
    return jnp.sum(b_act * t_act, axis=-1, keepdims=True) + params["bias"][0]


def reference_forward_bf16(beta, y, params):
    """Reference using the kernel's exact precision recipe (bf16 matmuls, f32 accum)."""
    nt = (((1,), (1,)), ((), ()))

    def lin(x, w, b):
        acc = lax.dot_general(x.astype(jnp.bfloat16), w.astype(jnp.bfloat16),
                              nt, preferred_element_type=jnp.float32)
        return jnp.maximum(acc + b, 0.0)

    b_act = beta
    for w, b in params["branch"]:
        b_act = lin(b_act, w, b)
    t_act = y
    for w, b in params["trunk"]:
        t_act = lin(t_act, w, b)
    return jnp.sum(b_act * t_act, axis=-1, keepdims=True) + params["bias"][0]


if __name__ == "__main__":
    key = jax.random.PRNGKey(0)
    k_beta, k_y, k_p = jax.random.split(key, 3)

    batch = 256          # -> 2 grid steps of 128 lanes (feeds both v7x TensorCores)
    sensor_dim = 16      # branch network input width
    in_dim = 2           # trunk network input width (e.g. an (x, t) coordinate)
    h_dim = 32           # hidden width

    beta = jax.random.normal(k_beta, (batch, sensor_dim), jnp.float32)
    y = jax.random.normal(k_y, (batch, in_dim), jnp.float32)
    params = init_params(k_p, sensor_dim, in_dim, h_dim)

    out = jax.block_until_ready(deeponet_forward(beta, y, params))
    assert out.shape == (batch, 1)

    ref_bf16 = reference_forward_bf16(beta, y, params)   # kernel-precision reference
    ref_f32 = reference_forward(beta, y, params)         # original-module (f32) reference
    assert jnp.allclose(out, ref_bf16, atol=2e-3, rtol=2e-3), \
        "mismatch vs bf16-precision reference"
    assert jnp.allclose(out, ref_f32, atol=1e-2, rtol=5e-2), \
        "mismatch vs f32 reference beyond bf16 tolerance"

    # ragged batch: exercises Pallas partial blocks (no wrapper-side padding needed)
    out_odd = jax.block_until_ready(deeponet_forward(beta[:200], y[:200], params))
    assert out_odd.shape == (200, 1)
    assert jnp.allclose(out_odd, ref_bf16[:200], atol=2e-3, rtol=2e-3), \
        "mismatch on ragged batch"

    print("KERNEL_OK")
</pallas_src>

<mosaic_0001>
module attributes {stable_mosaic.version = 11 : i64} {
  func.func @deeponet_kernel(%arg0: i32, %arg1: memref<128x16xf32, #tpu.memory_space<vmem>>, %arg2: memref<128x2xf32, #tpu.memory_space<vmem>>, %arg3: memref<320x64xbf16, #tpu.memory_space<vmem>>, %arg4: memref<64x5xf32, #tpu.memory_space<vmem>>, %arg5: memref<1x1xf32, #tpu.memory_space<smem>>, %arg6: memref<1x1x128xf32, #tpu.memory_space<vmem>>) attributes {dimension_semantics = [#tpu.dimension_semantics<parallel>], iteration_bounds = array<i64: 2>, scalar_prefetch = 0 : i64, scratch_operands = 0 : i64, tpu.core_type = #tpu.core_type<tc>, window_params = [{transform_indices = @transform_0, window_bounds = array<i64: 128, 16>}, {transform_indices = @transform_1, window_bounds = array<i64: 128, 2>}, {pipeline_mode = #tpu.pipeline_mode<synchronous>, transform_indices = @transform_2, window_bounds = array<i64: 320, 64>}, {pipeline_mode = #tpu.pipeline_mode<synchronous>, transform_indices = @transform_3, window_bounds = array<i64: 64, 5>}, {transform_indices = @transform_4, window_bounds = array<i64: 1, 1>}, {transform_indices = @transform_5, window_bounds = array<i64: 1, 1, 128>}]} {
    %c0 = arith.constant 0 : index
    %c0_0 = arith.constant 0 : index
    %0 = vector.load %arg3[%c0, %c0_0] : memref<320x64xbf16, #tpu.memory_space<vmem>>, vector<64x16xbf16>
    %c0_1 = arith.constant 0 : index
    %c0_2 = arith.constant 0 : index
    %1 = vector.load %arg1[%c0_1, %c0_2] : memref<128x16xf32, #tpu.memory_space<vmem>>, vector<128x16xf32>
    %2 = arith.truncf %1 : vector<128x16xf32> to vector<128x16xbf16>
    %cst = arith.constant dense<0.000000e+00> : vector<64x128xf32>
    %3 = tpu.matmul %0, %2, %cst {dimension_numbers = #tpu.dot_dimension_numbers<[1], [1], [0], [0], [0, 0, 1, 0], [], []>} : vector<64x16xbf16>, vector<128x16xbf16>, vector<64x128xf32> -> vector<64x128xf32>
    %c0_3 = arith.constant 0 : index
    %c16 = arith.constant 16 : index
    %4 = vector.load %arg3[%c0_3, %c16] : memref<320x64xbf16, #tpu.memory_space<vmem>>, vector<64x2xbf16>
    %c0_4 = arith.constant 0 : index
    %c0_5 = arith.constant 0 : index
    %5 = vector.load %arg2[%c0_4, %c0_5] : memref<128x2xf32, #tpu.memory_space<vmem>>, vector<128x2xf32>
    %6 = arith.truncf %5 : vector<128x2xf32> to vector<128x2xbf16>
    %cst_6 = arith.constant dense<0.000000e+00> : vector<64x128xf32>
    %7 = tpu.matmul %4, %6, %cst_6 {dimension_numbers = #tpu.dot_dimension_numbers<[1], [1], [0], [0], [0, 0, 1, 0], [], []>} : vector<64x2xbf16>, vector<128x2xbf16>, vector<64x128xf32> -> vector<64x128xf32>
    %8 = arith.addf %3, %7 : vector<64x128xf32>
    %c0_7 = arith.constant 0 : index
    %c0_8 = arith.constant 0 : index
    %9 = vector.load %arg4[%c0_7, %c0_8] : memref<64x5xf32, #tpu.memory_space<vmem>>, vector<64x1xf32>
    %10 = vector.broadcast %9 : vector<64x1xf32> to vector<64x128xf32>
    %11 = arith.addf %8, %10 : vector<64x128xf32>
    %cst_9 = arith.constant 0.000000e+00 : f32
    %12 = vector.broadcast %cst_9 : f32 to vector<64x128xf32>
    %13 = arith.maximumf %11, %12 : vector<64x128xf32>
    %14 = arith.truncf %13 : vector<64x128xf32> to vector<64x128xbf16>
    %c64 = arith.constant 64 : index
    %c0_10 = arith.constant 0 : index
    %15 = vector.load %arg3[%c64, %c0_10] : memref<320x64xbf16, #tpu.memory_space<vmem>>, vector<64x64xbf16>
    %cst_11 = arith.constant dense<0.000000e+00> : vector<64x128xf32>
    %16 = tpu.matmul %15, %14, %cst_11 {dimension_numbers = #tpu.dot_dimension_numbers<[1], [0], [0], [1], [0, 0, 1, 1], [], []>} : vector<64x64xbf16>, vector<64x128xbf16>, vector<64x128xf32> -> vector<64x128xf32>
    %c0_12 = arith.constant 0 : index
    %c1 = arith.constant 1 : index
    %17 = vector.load %arg4[%c0_12, %c1] : memref<64x5xf32, #tpu.memory_space<vmem>>, vector<64x1xf32>
    %18 = vector.broadcast %17 : vector<64x1xf32> to vector<64x128xf32>
    %19 = arith.addf %16, %18 : vector<64x128xf32>
    %cst_13 = arith.constant 0.000000e+00 : f32
    %20 = vector.broadcast %cst_13 : f32 to vector<64x128xf32>
    %21 = arith.maximumf %19, %20 : vector<64x128xf32>
    %22 = arith.truncf %21 : vector<64x128xf32> to vector<64x128xbf16>
    %c128 = arith.constant 128 : index
    %c0_14 = arith.constant 0 : index
    %23 = vector.load %arg3[%c128, %c0_14] : memref<320x64xbf16, #tpu.memory_space<vmem>>, vector<64x64xbf16>
    %cst_15 = arith.constant dense<0.000000e+00> : vector<64x128xf32>
    %24 = tpu.matmul %23, %22, %cst_15 {dimension_numbers = #tpu.dot_dimension_numbers<[1], [0], [0], [1], [0, 0, 1, 1], [], []>} : vector<64x64xbf16>, vector<64x128xbf16>, vector<64x128xf32> -> vector<64x128xf32>
    %c0_16 = arith.constant 0 : index
    %c2 = arith.constant 2 : index
    %25 = vector.load %arg4[%c0_16, %c2] : memref<64x5xf32, #tpu.memory_space<vmem>>, vector<64x1xf32>
    %26 = vector.broadcast %25 : vector<64x1xf32> to vector<64x128xf32>
    %27 = arith.addf %24, %26 : vector<64x128xf32>
    %cst_17 = arith.constant 0.000000e+00 : f32
    %28 = vector.broadcast %cst_17 : f32 to vector<64x128xf32>
    %29 = arith.maximumf %27, %28 : vector<64x128xf32>
    %30 = arith.truncf %29 : vector<64x128xf32> to vector<64x128xbf16>
    %c192 = arith.constant 192 : index
    %c0_18 = arith.constant 0 : index
    %31 = vector.load %arg3[%c192, %c0_18] : memref<320x64xbf16, #tpu.memory_space<vmem>>, vector<64x64xbf16>
    %cst_19 = arith.constant dense<0.000000e+00> : vector<64x128xf32>
    %32 = tpu.matmul %31, %30, %cst_19 {dimension_numbers = #tpu.dot_dimension_numbers<[1], [0], [0], [1], [0, 0, 1, 1], [], []>} : vector<64x64xbf16>, vector<64x128xbf16>, vector<64x128xf32> -> vector<64x128xf32>
    %c0_20 = arith.constant 0 : index
    %c3 = arith.constant 3 : index
    %33 = vector.load %arg4[%c0_20, %c3] : memref<64x5xf32, #tpu.memory_space<vmem>>, vector<64x1xf32>
    %34 = vector.broadcast %33 : vector<64x1xf32> to vector<64x128xf32>
    %35 = arith.addf %32, %34 : vector<64x128xf32>
    %cst_21 = arith.constant 0.000000e+00 : f32
    %36 = vector.broadcast %cst_21 : f32 to vector<64x128xf32>
    %37 = arith.maximumf %35, %36 : vector<64x128xf32>
    %38 = arith.truncf %37 : vector<64x128xf32> to vector<64x128xbf16>
    %c256 = arith.constant 256 : index
    %c0_22 = arith.constant 0 : index
    %39 = vector.load %arg3[%c256, %c0_22] : memref<320x64xbf16, #tpu.memory_space<vmem>>, vector<64x64xbf16>
    %cst_23 = arith.constant dense<0.000000e+00> : vector<64x128xf32>
    %40 = tpu.matmul %39, %38, %cst_23 {dimension_numbers = #tpu.dot_dimension_numbers<[1], [0], [0], [1], [0, 0, 1, 1], [], []>} : vector<64x64xbf16>, vector<64x128xbf16>, vector<64x128xf32> -> vector<64x128xf32>
    %c0_24 = arith.constant 0 : index
    %c4 = arith.constant 4 : index
    %41 = vector.load %arg4[%c0_24, %c4] : memref<64x5xf32, #tpu.memory_space<vmem>>, vector<64x1xf32>
    %42 = vector.broadcast %41 : vector<64x1xf32> to vector<64x128xf32>
    %43 = arith.addf %40, %42 : vector<64x128xf32>
    %cst_25 = arith.constant 0.000000e+00 : f32
    %44 = vector.broadcast %cst_25 : f32 to vector<64x128xf32>
    %45 = arith.maximumf %43, %44 : vector<64x128xf32>
    %46 = vector.extract_strided_slice %45 {offsets = [0, 0], sizes = [32, 128], strides = [1, 1]} : vector<64x128xf32> to vector<32x128xf32>
    %47 = vector.extract_strided_slice %45 {offsets = [32, 0], sizes = [32, 128], strides = [1, 1]} : vector<64x128xf32> to vector<32x128xf32>
    %48 = arith.mulf %46, %47 : vector<32x128xf32>
    %cst_26 = arith.constant dense<0.000000e+00> : vector<128xf32>
    %49 = vector.multi_reduction <add>, %48, %cst_26 [0] : vector<32x128xf32> to vector<128xf32>
    %50 = vector.shape_cast %49 : vector<128xf32> to vector<1x128xf32>
    %c0_27 = arith.constant 0 : index
    %c0_28 = arith.constant 0 : index
    %51 = memref.load %arg5[%c0_27, %c0_28] : memref<1x1xf32, #tpu.memory_space<smem>>
    %52 = vector.broadcast %51 : f32 to vector<1x128xf32>
    %53 = arith.addf %50, %52 : vector<1x128xf32>
    %c0_29 = arith.constant 0 : index
    %c0_30 = arith.constant 0 : index
    %c0_31 = arith.constant 0 : index
    %54 = vector.load %arg6[%c0_29, %c0_30, %c0_31] : memref<1x1x128xf32, #tpu.memory_space<vmem>>, vector<1x1x128xf32>
    %55 = vector.shape_cast %54 : vector<1x1x128xf32> to vector<1x128xf32>
    %56 = vector.shape_cast %53 : vector<1x128xf32> to vector<1x1x128xf32>
    tpu.vector_store %arg6[%c0_29, %c0_30, %c0_31], %56 {strides = array<i32>} : memref<1x1x128xf32, #tpu.memory_space<vmem>>, vector<1x1x128xf32>,
    return
  }
  func.func @transform_0(%arg0: i32) -> (i32, i32) {
    %c0_i32 = arith.constant 0 : i32
    %c0_i32_0 = arith.constant 0 : i32
    return %arg0, %c0_i32 : i32, i32
  }
  func.func @transform_1(%arg0: i32) -> (i32, i32) {
    %c0_i32 = arith.constant 0 : i32
    %c0_i32_0 = arith.constant 0 : i32
    return %arg0, %c0_i32 : i32, i32
  }
  func.func @transform_2(%arg0: i32) -> (i32, i32) {
    %c0_i32 = arith.constant 0 : i32
    %c0_i32_0 = arith.constant 0 : i32
    %c0_i32_1 = arith.constant 0 : i32
    return %c0_i32, %c0_i32_0 : i32, i32
  }
  func.func @transform_3(%arg0: i32) -> (i32, i32) {
    %c0_i32 = arith.constant 0 : i32
    %c0_i32_0 = arith.constant 0 : i32
    %c0_i32_1 = arith.constant 0 : i32
    return %c0_i32, %c0_i32_0 : i32, i32
  }
  func.func @transform_4(%arg0: i32) -> (i32, i32) {
    %c0_i32 = arith.constant 0 : i32
    %c0_i32_0 = arith.constant 0 : i32
    %c0_i32_1 = arith.constant 0 : i32
    return %c0_i32, %c0_i32_0 : i32, i32
  }
  func.func @transform_5(%arg0: i32) -> (i32, i32, i32) {
    %c0_i32 = arith.constant 0 : i32
    %c0_i32_0 = arith.constant 0 : i32
    %c0_i32_1 = arith.constant 0 : i32
    return %arg0, %c0_i32, %c0_i32_0 : i32, i32, i32
  }
}

</mosaic_0001>

<bundles_post_ra>
// kernel: tpu_custom_call.1
= control target key start
LH: loop header
LB: loop body
LE: loop exit
PB: predicated region body
PF: predicated region fallthrough
CT: control target
= control target key end

     0   :  { %s2043_s0 = inlined_call_operand.vmem [shape: f32[256,16], index: 0, kind: input, shape index: {}]   ;;  %s2044_s1 = inlined_call_operand.vmem [shape: f32[256,2], index: 1, kind: input, shape index: {}]   ;;  %s2045_s2 = inlined_call_operand.vmem [shape: bf16[320,64], index: 2, kind: input, shape index: {}]   ;;  %s2046_s3 = inlined_call_operand.vmem [shape: f32[64,5], index: 3, kind: input, shape index: {}]   ;;  %s2047_s4 = inlined_call_operand.<no memory space> [shape: f32[1,1], index: 4, kind: input, shape index: {}]   ;;  %s2048_s5 = inlined_call_operand.hbm [shape: f32[2,1,128], index: 5, kind: output, shape index: {}]  }
   0x1   :  { %10 = sst [smem:[#allocation2]] %s2047_s4 }
   0x2   :  { %11 = vsyncpa [#allocation4], 0 }
   0x3   :  { %13 = vsyncpa [#allocation4 + $0x1], 0  ;;  %s1710_s20 = smov 0   ;;  %s1712_s21 = smov 0  }
   0x4   :  { %s1714_s22 = smov 0   ;;  %s1716_s23 = smov 0  }
   0x5 LB: > { %s1293_s4 = sadd.s32 4294967295, %s1668_s23   ;;  %s1294_s24 = sadd.s32 4294967294, %s1668_s23   ;;  %s1668_s23 = sphi %s1716_s23, %s2054_s23   ;;  %s1664_s22 = sphi %s1714_s22, %s2053_s22   ;;  %s1660_s21 = sphi %s1712_s21, %s2052_s21   ;;  %s1656_s20 = sphi %s1710_s20, %s2051_s20  }
   0x6   : > { %s1733_s25 = sadd.s32 1, %s1668_s23   ;;  %s141_s26 = sadd.s32 1, %s1664_s22 }
   0x7   : > { %s138_s27 = ssub.s32 %s1668_s23, %s1733_s25  ;;  %p151_p0 = scmp.ne.s32.totalorder %s1664_s22, %s1660_s21 }
   0x8   : > { %p139_p1 = scmp.eq.s32.totalorder %s138_s27, 0  ;;  %p152_p2 = scmp.eq.s32.totalorder %s1293_s4, 1 }
   0x9   : > { %p157_p3 = scmp.ne.s32.totalorder %s1660_s21, %s1656_s20  ;;  %p158_p4 = scmp.eq.s32.totalorder %s1294_s24, 1 }
   0xa   : > { %s1743_s28 = scalar_select %p139_p1, %s1664_s22, %s141_s26  }
   0xb   : > { %p1745_p5 = por %p152_p2, %p151_p0  ;;  %p1749_p6 = por %p158_p4, %p157_p3 }
   0xc   : > { %p1297_p7 = scmp.ge.s32.totalorder %s1668_s23, 1  ;;  %p203_p8 = scmp.lt.s32.totalorder %s1668_s23, 3 }
   0xe   : > { %p204_p9 = pnand %p1297_p7, %p203_p8 }
   0xf   : > { %s1763_s10 = sshll.u32 (!%p204_p9), %s1293_s4, 4  ;;  %s1670_s11 = smov (!%p204_p9), 112  }
  0x10   : > { %207 = sbr.rel (%p204_p9) target bundleno = 1297 (0x511), region = 40  ;;  %p236_p10 = scmp.lt.s32.totalorder (!%p204_p9), %s1763_s10, 31 }
  0x11   : > { %s1210_s24 = sld [smem:[#allocation2]] (!%p204_p9)  ;;  %s233_s27 = sand.u32 (!%p204_p9), 1, %s1660_s21  }
  0x12   : > { %s1225_s9 = scalar_lea.hbm (!%p204_p9), %s2048_s5, %s1763_s10  ;;  %s1676_s13 = smov (!%p204_p9), [#allocation3]  }
  0x13   : > { %s1612_s14 = sshll.u32 (!%p204_p9), %s1676_s13, 4  ;;  %s1613_s14 = int_to_ptr.vmem [resolvable:$false] %s1612_s14 }
  0x14   : > { %s1614_s15 = scalar_lea.vmem (!%p204_p9), %s1613_s14, 32 }
  0x15   : > { %v1588_v0 = vld [vmem:[%s2045_s2] sm:$0xff]   ;;  %v1761_v1 = vld [vmem:[%s2045_s2 + $0x8] sm:$0xff]   ;;  %v1768_v2 = vld [vmem:[%s2045_s2 + $0x10] sm:$0xff]   ;;  %vm434_vm0 = vcmask 130048   ;;  %s237_s16 = scalar_select %p236_p10, %s1763_s10, 31  ;;  %v1671_v4 = vmov 0  }
  0x16   : > { %324 = vrot.lane.b32.xlu0 %v1588_v0, %s1670_s11  ;;  %328 = vrot.lane.b32.xlu1 %v1768_v2, %s1670_s11  ;;  %v1775_v3 = vld [vmem:[%s2045_s2 + $0x18] sm:$0xff]   ;;  %v1783_v5 = vld [vmem:[%s2046_s3 + $0x30] sm:$0xff]  ;;  %vm332_vm1 = vcmask 15360   ;;  %vm664_vm2 = vcmask 523264  }
  0x17   : > { %1445 = vmatprep.mubr.msk.bf16.mxu1 %vm434_vm0, %v1588_v0  ;;  %1579 = vset.pattern.permute.xlu1 %v1671_v4  ;;  %s1299_s17 = sshll.u32 %s237_s16, 3  ;;  %v1810_v19 = vld [vmem:[%s2046_s3 + $0x38] sm:$0xff]  ;;  %v1817_v21 = vld [vmem:[%s2046_s3 + $0x28] sm:$0xff]  ;;  %v1829_v26 = vld [vmem:[%s2046_s3 + $0x20] sm:$0xff] }
  0x18   : > { %1578 = vset.pattern.permute.xlu0 %v1671_v4  ;;  %s1788_s26 = scalar_lea.vmem %s2043_s0, %s1299_s17  ;;  %s1793_s7 = scalar_lea.vmem %s2044_s1, %s1299_s17  ;;  %v1835_v27 = vld [vmem:[%s2046_s3 + $0x18] sm:$0xff]  ;;  %v1843_v32 = vld [vmem:[%s2046_s3 + $0x10] sm:$0xff]  ;;  %v1849_v33 = vld [vmem:[%s2046_s3 + $0x8] sm:$0xff] }
  0x19   : > { %v270_v6 = vld [vmem:[%s1788_s26 + $0x70] sm:$0xff]  ;;  %v271_v7 = vld [vmem:[%s1788_s26 + $0x78] sm:$0xff]  ;;  %v268_v11 = vld [vmem:[%s1788_s26 + $0x60] sm:$0xff] }
  0x1a   : > { %326 = vrot.lane.b32.xlu0 %v1761_v1, %s1670_s11  ;;  %330 = vrot.lane.b32.xlu1 %v1775_v3, %s1670_s11  ;;  %v294_v8 = vld [vmem:[%s1793_s7 + $0x70] sm:$0xff]  ;;  %v279_v9 = vpack.c.bf16 %v271_v7, %v270_v6  ;;  %v295_v10 = vld [vmem:[%s1793_s7 + $0x78] sm:$0xff]  ;;  %s1215_s11 = scalar_lea.sflag [#allocation4], %s233_s27 }
  0x1b   : > { %v269_v12 = vld [vmem:[%s1788_s26 + $0x68] sm:$0xff]  ;;  %v303_v13 = vpack.c.bf16 %v295_v10, %v294_v8  ;;  %v292_v15 = vld [vmem:[%s1793_s7 + $0x60] sm:$0xff]  ;;  %v266_v22 = vld [vmem:[%s1788_s26 + $0x50] sm:$0xff] }
  0x1c   : > { %v278_v14 = vpack.c.bf16 %v269_v12, %v268_v11  ;;  %v293_v16 = vld [vmem:[%s1793_s7 + $0x68] sm:$0xff]  ;;  %1525 = vmatprep.subr.msk.bf16.mxu1 %vm434_vm0, %v279_v9  ;;  %v469_v17 = vsel %vm434_vm0, %v279_v9, 0  ;;  %v267_v23 = vld [vmem:[%s1788_s26 + $0x58] sm:$0xff]  ;;  %v290_v24 = vld [vmem:[%s1793_s7 + $0x50] sm:$0xff] }
  0x1d   : > { %v302_v18 = vpack.c.bf16 %v293_v16, %v292_v15  ;;  %1430 = vmatpush3.bf16.xpose.msra.mxu1 %v469_v17  ;;  %1517 = vmatprep.subr.msk.bf16.mxu0 %vm332_vm1, %v303_v13  ;;  %v367_v20 = vsel %vm332_vm1, %v303_v13, 0  ;;  %v291_v25 = vld [vmem:[%s1793_s7 + $0x58] sm:$0xff]  ;;  %v277_v29 = vpack.c.bf16 %v267_v23, %v266_v22  ;;  %v264_v34 = vld [vmem:[%s1788_s26 + $0x40] sm:$0xff]  ;;  %v265_v35 = vld [vmem:[%s1788_s26 + $0x48] sm:$0xff] }
  0x1e   : > { %576 = vperm.xlu0 %1578, %v1783_v5   ;;  %1406 = vmatpush3.bf16.xpose.msra.mxu0 %v367_v20  ;;  %v466_v28 = vsel %vm434_vm0, %v278_v14, 0  ;;  %v301_v30 = vpack.c.bf16 %v291_v25, %v290_v24  ;;  %v288_v38 = vld [vmem:[%s1793_s7 + $0x40] sm:$0xff]  ;;  %v289_v39 = vld [vmem:[%s1793_s7 + $0x48] sm:$0xff]  ;;  %v276_v41 = vpack.c.bf16 %v265_v35, %v264_v34  ;;  %v262_v43 = vld [vmem:[%s1788_s26 + $0x30] sm:$0xff] }
  0x1f   : > { %1526 = vmatprep.subr.msk.bf16.mxu1 %vm434_vm0, %v278_v14  ;;  %1518 = vmatprep.subr.msk.bf16.mxu0 %vm332_vm1, %v302_v18  ;;  %v364_v31 = vsel %vm332_vm1, %v302_v18, 0  ;;  %v463_v36 = vsel %vm434_vm0, %v277_v29, 0  ;;  %v1861_v40 = vld [vmem:[%s2046_s3] sm:$0xff]  ;;  %v300_v42 = vpack.c.bf16 %v289_v39, %v288_v38  ;;  %v263_v44 = vld [vmem:[%s1788_s26 + $0x38] sm:$0xff]  ;;  %v286_v45 = vld [vmem:[%s1793_s7 + $0x30] sm:$0xff] }
  0x20   : > { %581 = vperm.xlu1 %1579, %v1810_v19   ;;  %v361_v37 = vsel %vm332_vm1, %v301_v30, 0  ;;  %v287_v46 = vld [vmem:[%s1793_s7 + $0x38] sm:$0xff]  ;;  %v460_v47 = vsel %vm434_vm0, %v276_v41, 0  ;;  %v275_v48 = vpack.c.bf16 %v263_v44, %v262_v43  ;;  %v260_v51 = vld [vmem:[%s1788_s26 + $0x20] sm:$0xff]  ;;  %v261_v52 = vld [vmem:[%s1788_s26 + $0x28] sm:$0xff] }
  0x21   : > { %v358_v49 = vsel %vm332_vm1, %v300_v42, 0  ;;  %v299_v50 = vpack.c.bf16 %v287_v46, %v286_v45  ;;  %v284_v53 = vld [vmem:[%s1793_s7 + $0x20] sm:$0xff]  ;;  %v285_v54 = vld [vmem:[%s1793_s7 + $0x28] sm:$0xff]  ;;  %v274_v56 = vpack.c.bf16 %v261_v52, %v260_v51  ;;  %v258_v59 = vld [vmem:[%s1788_s26 + $0x10] sm:$0xff] }
  0x22   : > { %571 = vperm.xlu0 %1578, %v1817_v21   ;;  %v457_v55 = vsel %vm434_vm0, %v275_v48, 0  ;;  %v298_v58 = vpack.c.bf16 %v285_v54, %v284_v53  ;;  %v259_v60 = vld [vmem:[%s1788_s26 + $0x18] sm:$0xff]  ;;  %v282_v61 = vld [vmem:[%s1793_s7 + $0x10] sm:$0xff]  ;;  %v256_v7 = vld [vmem:[%s1788_s26] sm:$0xff] }
  0x23   : > { %v355_v57 = vsel %vm332_vm1, %v299_v50, 0  ;;  %v283_v62 = vld [vmem:[%s1793_s7 + $0x18] sm:$0xff]  ;;  %v454_v63 = vsel %vm434_vm0, %v274_v56, 0  ;;  %v273_v0 = vpack.c.bf16 %v259_v60, %v258_v59  ;;  %v257_v8 = vld [vmem:[%s1788_s26 + $0x8] sm:$0xff]  ;;  %v280_v9 = vld [vmem:[%s1793_s7] sm:$0xff]  ;;  %s234_s26 = scalar_lea.vmem [#allocation3], %s233_s27 }
  0x24   : > { %566 = vperm.xlu1 %1579, %v1829_v26   ;;  %v352_v4 = vsel %vm332_vm1, %v298_v58, 0  ;;  %v297_v6 = vpack.c.bf16 %v283_v62, %v282_v61  ;;  %v281_v10 = vld [vmem:[%s1793_s7 + $0x8] sm:$0xff]  ;;  %v272_v12 = vpack.c.bf16 %v257_v8, %v256_v7  ;;  %s1227_s6 = sshll.u32 %s234_s26, 4  ;;  %s1228_s6 = int_to_ptr.vmem [resolvable:$true] %s1227_s6 }
  0x25   : > { %1432 = vmatpush3.bf16.xpose.msra.mxu1 %v466_v28  ;;  %v451_v11 = vsel %vm434_vm0, %v273_v0, 0  ;;  %v296_v14 = vpack.c.bf16 %v281_v10, %v280_v9  ;;  %s1608_s12 = scalar_lea.vmem %s1228_s6, 16  ;;  %p1615_p0 = scmp.lt.s32.totalorder %s1228_s6, %s1613_s14 }
  0x26   : > { %561 = vperm.xlu0 %1578, %v1835_v27   ;;  %1408 = vmatpush3.bf16.xpose.msra.mxu0 %v364_v31  ;;  %v349_v13 = vsel %vm332_vm1, %v297_v6, 0  ;;  %v448_v15 = vsel %vm434_vm0, %v272_v12, 0  ;;  %p1609_p11 = scmp.ne.s32.totalorder %s1228_s6, %s1608_s12  ;;  %p1616_p1 = scmp.lt.s32.totalorder %s1614_s15, %s1608_s12 }
  0x27   : > { %1527 = vmatprep.subr.msk.bf16.mxu1 %vm434_vm0, %v277_v29  ;;  %1519 = vmatprep.subr.msk.bf16.mxu0 %vm332_vm1, %v301_v30  ;;  %v346_v16 = vsel %vm332_vm1, %v296_v14, 0 }
  0x28   : > { %556 = vperm.xlu1 %1579, %v1843_v32   ;;  %p1610_p12 = pnand %p1609_p11, %p1745_p5  ;;  %p1617_p2 = por %p1616_p1, %p1615_p0 }
  0x2a   : > { %551 = vperm.xlu0 %1578, %v1849_v33   ;;  %p1611_p13 = pneg %p1610_p12 }
  0x2c   : > { %546 = vperm.xlu1 %1579, %v1861_v40   ;;  %p1618_p3 = pnand %p1617_p2, %p1611_p13 }
  0x2d   : > { %1434 = vmatpush3.bf16.xpose.msra.mxu1 %v463_v36 }
  0x2e   : > { %1410 = vmatpush3.bf16.xpose.msra.mxu0 %v361_v37  ;;  %1528 = vmatprep.subr.msk.bf16.mxu1 %vm434_vm0, %v276_v41 }
  0x2f   : > { %1520 = vmatprep.subr.msk.bf16.mxu0 %vm332_vm1, %v300_v42 }
  0x35   : > { %1436 = vmatpush3.bf16.xpose.msra.mxu1 %v460_v47 }
  0x36   : > { %1412 = vmatpush3.bf16.xpose.msra.mxu0 %v358_v49  ;;  %1529 = vmatprep.subr.msk.bf16.mxu1 %vm434_vm0, %v275_v48 }
  0x37   : > { %1521 = vmatprep.subr.msk.bf16.mxu0 %vm332_vm1, %v299_v50 }
  0x3d   : > { %1438 = vmatpush3.bf16.xpose.msra.mxu1 %v457_v55 }
  0x3e   : > { %1414 = vmatpush3.bf16.xpose.msra.mxu0 %v355_v57  ;;  %1530 = vmatprep.subr.msk.bf16.mxu1 %vm434_vm0, %v274_v56 }
  0x3f   : > { %1522 = vmatprep.subr.msk.bf16.mxu0 %vm332_vm1, %v298_v58 }
  0x45   : > { %1440 = vmatpush3.bf16.xpose.msra.mxu1 %v454_v63 }
  0x46   : > { %1416 = vmatpush3.bf16.xpose.msra.mxu0 %v352_v4  ;;  %1531 = vmatprep.subr.msk.bf16.mxu1 %vm434_vm0, %v273_v0 }
  0x47   : > { %1523 = vmatprep.subr.msk.bf16.mxu0 %vm332_vm1, %v297_v6 }
  0x4d   : > { %1442 = vmatpush3.bf16.xpose.msra.mxu1 %v451_v11 }
  0x4e   : > { %1418 = vmatpush3.bf16.xpose.msra.mxu0 %v349_v13  ;;  %1532 = vmatprep.subr.msk.bf16.mxu1 %vm434_vm0, %v272_v12 }
  0x4f   : > { %1524 = vmatprep.subr.msk.bf16.mxu0 %vm332_vm1, %v296_v14 }
  0x55   : > { %1444 = vmatpush3.bf16.xpose.msra.mxu1 %v448_v15 }
  0x56   : > { %1420 = vmatpush3.bf16.xpose.msra.mxu0 %v346_v16 }
  0x5c   : > { %1446 = vmatmul.mubr.msk.bf16.vlgmr.msra.gmra.mxu1 %vm434_vm0, %v1761_v1  ;;  %v1592_v1 = vld [vmem:[%s2045_s2 + $0x20] sm:$0xff]  }
  0x5d   : > { %1449 = vmatprep.mubr.msk.bf16.mxu1 %vm434_vm0, %v1768_v2  ;;  %v1672_v2 = vmov 1  }
  0x5e   : > { %1580 = vset.pattern.permute.xlu1 %v1672_v2  ;;  %1581 = vset.pattern.permute.xlu0 %v1672_v2  ;;  %v1596_v2 = vld [vmem:[%s2045_s2 + $0x40] sm:$0xff]  }
  0x5f   : > { %637 = vperm.xlu1 %1580, %v1783_v5   ;;  %641 = vperm.xlu0 %1581, %v1810_v19  }
  0x63   : > { %629 = vperm.xlu1 %1580, %v1829_v26   ;;  %621 = vperm.xlu0 %1581, %v1843_v32  }
  0x64   : > { %1450 = vmatmul.mubr.msk.bf16.gmra.mxu1 %vm434_vm0, %v1775_v3 }
  0x65   : > { %1477 = vmatprep.mubr.msk.bf16.mxu1 %vm664_vm2, %v1596_v2 }
  0x67   : > { %633 = vperm.xlu1 %1580, %v1817_v21   ;;  %613 = vperm.xlu0 %1581, %v1861_v40  }
  0x6b   : > { %625 = vperm.xlu1 %1580, %v1835_v27  }
  0x6f   : > { %617 = vperm.xlu1 %1580, %v1849_v33  }
  0x88   : > { %v325_v17 = vpop.permute.xlu0 %324  ;;  %v329_v18 = vpop.permute.xlu1 %328 }
  0x89   : > { %1421 = vmatprep.mubr.msk.bf16.mxu0 %vm332_vm1, %v325_v17 }
  0x8c   : > { %v327_v20 = vpop.permute.xlu0 %326  ;;  %v331_v22 = vpop.permute.xlu1 %330 }
  0x8d   : > { %1422 = vmatmul.mubr.msk.bf16.vlgmr.msra.gmra.mxu0 %vm332_vm1, %v327_v20  ;;  %v1593_v20 = vld [vmem:[%s2045_s2 + $0x28] sm:$0xff]  }
  0x8e   : > { %1425 = vmatprep.mubr.msk.bf16.mxu0 %vm332_vm1, %v329_v18 }
  0x95   : > { %1426 = vmatmul.mubr.msk.bf16.gmra.mxu0 %vm332_vm1, %v331_v22  ;;  %v1594_v22 = vld [vmem:[%s2045_s2 + $0x30] sm:$0xff]  }
  0x96   : > { %1461 = vmatprep.mubr.msk.bf16.mxu0 %vm664_vm2, %v1592_v1  ;;  %v1595_v1 = vld [vmem:[%s2045_s2 + $0x38] sm:$0xff]  }
  0x99   : > { %v577_v28 = vpop.permute.xlu0 %576 }
  0x9b   : > { %v582_v30 = vpop.permute.xlu1 %581 }
  0x9d   : > { %v572_v36 = vpop.permute.xlu0 %571 }
  0x9f   : > { %v567_v39 = vpop.permute.xlu1 %566 }
  0xa1   : > { %v562_v46 = vpop.permute.xlu0 %561 }
  0xa3   : > { %v557_v49 = vpop.permute.xlu1 %556 }
  0xa5   : > { %v552_v0 = vpop.permute.xlu0 %551 }
  0xa7   : > { %v547_v9 = vpop.permute.xlu1 %546 }
 0x11c   : > { %v1447_v3 = vpop.f32.mrf.mxu1 }
 0x11e   : > { %v505_v23 = vpop.f32.mrf.mxu1 }
 0x120   : > { %v1448_v24 = vpop.f32.mrf.mxu1 }
 0x122   : > { %v508_v25 = vpop.f32.mrf.mxu1 }
 0x124   : > { %v1451_v34 = vpop.f32.mrf.mxu1 }
 0x126   : > { %v521_v37 = vpop.f32.mrf.mxu1 }
 0x128   : > { %v1452_v43 = vpop.f32.mrf.mxu1 }
 0x12a   : > { %v524_v53 = vpop.f32.mrf.mxu1 }
 0x14d   : > { %v1423_v29 = vpop.f32.mrf.mxu0 }
 0x14e   : > { %v514_v52 = vadd.f32 %v1447_v3, %v1423_v29  ;;  %v1673_v3 = vmov 2  }
 0x14f   : > { %v403_v31 = vpop.f32.mrf.mxu0  ;;  %1583 = vset.pattern.permute.xlu1 %v1673_v3  ;;  %1582 = vset.pattern.permute.xlu0 %v1673_v3 }
 0x150   : > { %v586_v63 = vadd.f32 %v557_v49, %v514_v52  ;;  %v506_v4 = vadd.f32 %v505_v23, %v403_v31  ;;  %791 = vperm.xlu1 %1583, %v1810_v19   ;;  %787 = vperm.xlu0 %1582, %v1783_v5   ;;  %v638_v23 = vpop.permute.xlu1 %637  ;;  %v642_v31 = vpop.permute.xlu0 %641 }
 0x151   : > { %v1424_v35 = vpop.f32.mrf.mxu0 }
 0x152   : > { %v517_v47 = vadd.f32 %v1448_v24, %v1424_v35  ;;  %v594_v13 = vmax.f32 %v586_v63, 0.0  ;;  %v584_v14 = vadd.f32 %v547_v9, %v506_v4  ;;  %v1598_v4 = vld [vmem:[%s2045_s2 + $0x50] sm:$0xff]  }
 0x153   : > { %v406_v38 = vpop.f32.mrf.mxu0 }
 0x154   : > { %v587_v58 = vadd.f32 %v562_v46, %v517_v47  ;;  %v509_v59 = vadd.f32 %v508_v25, %v406_v38  ;;  %v592_v17 = vmax.f32 %v584_v14, 0.0  ;;  %779 = vperm.xlu1 %1583, %v1829_v26   ;;  %783 = vperm.xlu0 %1582, %v1817_v21   ;;  %v630_v24 = vpop.permute.xlu1 %629 }
 0x155   : > { %v1427_v41 = vpop.f32.mrf.mxu0 }
 0x156   : > { %v530_v42 = vadd.f32 %v1451_v34, %v1427_v41  ;;  %v595_v10 = vmax.f32 %v587_v58, 0.0  ;;  %v585_v11 = vadd.f32 %v552_v0, %v509_v59  ;;  %v1597_v0 = vld [vmem:[%s2045_s2 + $0x48] sm:$0xff]  }
 0x157   : > { %v419_v44 = vpop.f32.mrf.mxu0 }
 0x158   : > { %v522_v45 = vadd.f32 %v521_v37, %v419_v44  ;;  %v590_v50 = vadd.f32 %v577_v28, %v530_v42  ;;  %v593_v15 = vmax.f32 %v585_v11, 0.0  ;;  %v601_v16 = vpack.c.bf16 %v595_v10, %v594_v13  ;;  %771 = vperm.xlu1 %1583, %v1843_v32   ;;  %775 = vperm.xlu0 %1582, %v1835_v27   ;;  %v634_v29 = vpop.permute.xlu1 %633 }
 0x159   : > { %v1428_v48 = vpop.f32.mrf.mxu0 }
 0x15a   : > { %v533_v51 = vadd.f32 %v1452_v43, %v1428_v48  ;;  %v588_v55 = vadd.f32 %v567_v39, %v522_v45  ;;  %v598_v60 = vmax.f32 %v590_v50, 0.0  ;;  %v600_v18 = vpack.c.bf16 %v593_v15, %v592_v17  ;;  %v622_v39 = vpop.permute.xlu0 %621 }
 0x15b   : > { %v422_v54 = vpop.f32.mrf.mxu0 }
 0x15c   : > { %v591_v56 = vadd.f32 %v582_v30, %v533_v51  ;;  %v525_v57 = vadd.f32 %v524_v53, %v422_v54  ;;  %v596_v6 = vmax.f32 %v588_v55, 0.0  ;;  %763 = vperm.xlu1 %1583, %v1861_v40   ;;  %767 = vperm.xlu0 %1582, %v1849_v33  }
 0x15e   : > { %v599_v61 = vmax.f32 %v591_v56, 0.0  ;;  %v589_v62 = vadd.f32 %v572_v36, %v525_v57  ;;  %v626_v36 = vpop.permute.xlu1 %625  ;;  %v614_v54 = vpop.permute.xlu0 %613 }
 0x160   : > { %v597_v7 = vmax.f32 %v589_v62, 0.0  ;;  %v603_v8 = vpack.c.bf16 %v599_v61, %v598_v60 }
 0x162   : > { %1453 = vmatprep.subr.bf16.mxu0 %v603_v8  ;;  %v602_v12 = vpack.c.bf16 %v597_v7, %v596_v6  ;;  %v618_v49 = vpop.permute.xlu1 %617  ;;  %v1599_v6 = vld [vmem:[%s2045_s2 + $0x58] sm:$0xff]   ;;  %v1600_v7 = vld [vmem:[%s2045_s2 + $0x60] sm:$0xff]  }
 0x163   : > { %1454 = vmatpush3.bf16.msra.mxu0 %v603_v8  ;;  %v1674_v8 = vmov 3  }
 0x164   : > { %1455 = vmatprep.subr.bf16.mxu0 %v602_v12  ;;  %1584 = vset.pattern.permute.xlu1 %v1674_v8 }
 0x165   : > { %1585 = vset.pattern.permute.xlu0 %v1674_v8  ;;  %936 = vperm.xlu1 %1584, %v1783_v5  }
 0x166   : > { %940 = vperm.xlu0 %1585, %v1810_v19  }
 0x167   : > { %1456 = vmatpush3.bf16.msra.mxu0 %v602_v12 }
 0x168   : > { %1457 = vmatprep.subr.bf16.mxu0 %v601_v16 }
 0x169   : > { %928 = vperm.xlu1 %1584, %v1829_v26  }
 0x16a   : > { %920 = vperm.xlu0 %1585, %v1843_v32  }
 0x16b   : > { %1458 = vmatpush3.bf16.msra.mxu0 %v601_v16 }
 0x16c   : > { %1459 = vmatprep.subr.bf16.mxu0 %v600_v18 }
 0x16d   : > { %932 = vperm.xlu1 %1584, %v1817_v21  }
 0x16e   : > { %912 = vperm.xlu0 %1585, %v1861_v40  }
 0x16f   : > { %1460 = vmatpush3.bf16.msra.mxu0 %v600_v18 }
 0x171   : > { %924 = vperm.xlu1 %1584, %v1835_v27  }
 0x172   : > { %1462 = vmatmul.mubr.msk.bf16.vlgmr.msra.gmra.mxu0 %vm664_vm2, %v1593_v20 }
 0x173   : > { %1465 = vmatprep.mubr.msk.bf16.mxu0 %vm664_vm2, %v1594_v22 }
 0x175   : > { %916 = vperm.xlu1 %1584, %v1849_v33  }
 0x17a   : > { %1466 = vmatmul.mubr.msk.bf16.gmra.mxu0 %vm664_vm2, %v1595_v1 }
 0x17b   : > { %1493 = vmatprep.mubr.msk.bf16.mxu0 %vm664_vm2, %v1600_v7 }
 0x1cb   : > { %v788_v9 = vpop.permute.xlu0 %787  ;;  %v792_v10 = vpop.permute.xlu1 %791 }
 0x1cf   : > { %v784_v13 = vpop.permute.xlu0 %783  ;;  %v780_v15 = vpop.permute.xlu1 %779 }
 0x1d3   : > { %v776_v18 = vpop.permute.xlu0 %775  ;;  %v772_v1 = vpop.permute.xlu1 %771 }
 0x232   : > { %v1463_v25 = vpop.f32.mrf.mxu0 }
 0x233   : > { %v720_v50 = vadd.f32 %v1463_v25, %v622_v39 }
 0x234   : > { %v711_v28 = vpop.f32.mrf.mxu0 }
 0x235   : > { %v744_v58 = vmax.f32 %v720_v50, 0.0  ;;  %v712_v59 = vadd.f32 %v711_v28, %v614_v54  ;;  %v1602_v50 = vld [vmem:[%s2045_s2 + $0x70] sm:$0xff]  }
 0x236   : > { %v1464_v30 = vpop.f32.mrf.mxu0 }
 0x237   : > { %v723_v45 = vadd.f32 %v1464_v30, %v626_v36  ;;  %v742_v62 = vmax.f32 %v712_v59, 0.0 }
 0x238   : > { %v714_v34 = vpop.f32.mrf.mxu0 }
 0x239   : > { %v745_v55 = vmax.f32 %v723_v45, 0.0  ;;  %v715_v56 = vadd.f32 %v714_v34, %v618_v49  ;;  %v1601_v49 = vld [vmem:[%s2045_s2 + $0x68] sm:$0xff]  }
 0x23a   : > { %v1467_v35 = vpop.f32.mrf.mxu0 }
 0x23b   : > { %v736_v38 = vadd.f32 %v1467_v35, %v638_v23  ;;  %v751_v60 = vpack.c.bf16 %v745_v55, %v744_v58  ;;  %v743_v61 = vmax.f32 %v715_v56, 0.0 }
 0x23c   : > { %v727_v37 = vpop.f32.mrf.mxu0 }
 0x23d   : > { %v728_v42 = vadd.f32 %v727_v37, %v630_v24  ;;  %v748_v46 = vmax.f32 %v736_v38, 0.0  ;;  %v750_v63 = vpack.c.bf16 %v743_v61, %v742_v62  ;;  %v764_v38 = vpop.permute.xlu1 %763 }
 0x23e   : > { %v1468_v41 = vpop.f32.mrf.mxu0 }
 0x23f   : > { %v739_v43 = vadd.f32 %v1468_v41, %v642_v31  ;;  %v746_v51 = vmax.f32 %v728_v42, 0.0  ;;  %v768_v31 = vpop.permute.xlu0 %767 }
 0x240   : > { %v730_v44 = vpop.f32.mrf.mxu0 }
 0x241   : > { %v749_v47 = vmax.f32 %v739_v43, 0.0  ;;  %v731_v48 = vadd.f32 %v730_v44, %v634_v29  ;;  %v937_v54 = vpop.permute.xlu1 %936 }
 0x243   : > { %v753_v52 = vpack.c.bf16 %v749_v47, %v748_v46  ;;  %v747_v53 = vmax.f32 %v731_v48, 0.0  ;;  %v941_v59 = vpop.permute.xlu0 %940 }
 0x245   : > { %v752_v57 = vpack.c.bf16 %v747_v53, %v746_v51  ;;  %1469 = vmatprep.subr.bf16.mxu1 %v753_v52  ;;  %v1603_v51 = vld [vmem:[%s2045_s2 + $0x78] sm:$0xff]   ;;  %v1675_v53 = vmov 4   ;;  %v929_v55 = vpop.permute.xlu1 %928 }
 0x246   : > { %1470 = vmatpush3.bf16.msra.mxu1 %v753_v52  ;;  %v1604_v52 = vld [vmem:[%s2045_s2 + $0x80] sm:$0xff]   ;;  %1587 = vset.pattern.permute.xlu1 %v1675_v53 }
 0x247   : > { %1471 = vmatprep.subr.bf16.mxu1 %v752_v57  ;;  %1586 = vset.pattern.permute.xlu0 %v1675_v53  ;;  %v921_v62 = vpop.permute.xlu0 %920 }
 0x248   : > { %1065 = vperm.xlu1 %1587, %v1849_v33   ;;  %1061 = vperm.xlu0 %1586, %v1861_v40  }
 0x249   : > { %v933_v58 = vpop.permute.xlu1 %932 }
 0x24a   : > { %1472 = vmatpush3.bf16.msra.mxu1 %v752_v57 }
 0x24b   : > { %1473 = vmatprep.subr.bf16.mxu1 %v751_v60 }
 0x24c   : > { %1077 = vperm.xlu1 %1587, %v1829_v26   ;;  %1081 = vperm.xlu0 %1586, %v1817_v21  }
 0x24d   : > { %v925_v26 = vpop.permute.xlu1 %924 }
 0x24e   : > { %1474 = vmatpush3.bf16.msra.mxu1 %v751_v60 }
 0x24f   : > { %1475 = vmatprep.subr.bf16.mxu1 %v750_v63 }
 0x250   : > { %1069 = vperm.xlu1 %1587, %v1843_v32   ;;  %1085 = vperm.xlu0 %1586, %v1783_v5  }
 0x251   : > { %v917_v7 = vpop.permute.xlu1 %916 }
 0x252   : > { %1476 = vmatpush3.bf16.msra.mxu1 %v750_v63 }
 0x254   : > { %1073 = vperm.xlu1 %1587, %v1835_v27   ;;  %1089 = vperm.xlu0 %1586, %v1810_v19  }
 0x255   : > { %1478 = vmatmul.mubr.msk.bf16.vlgmr.msra.gmra.mxu1 %vm664_vm2, %v1597_v0 }
 0x256   : > { %1481 = vmatprep.mubr.msk.bf16.mxu1 %vm664_vm2, %v1598_v4 }
 0x25d   : > { %1482 = vmatmul.mubr.msk.bf16.gmra.mxu1 %vm664_vm2, %v1599_v6 }
 0x25e   : > { %1509 = vmatprep.mubr.msk.bf16.mxu1 %vm664_vm2, %v1604_v52 }
 0x315   : > { %v1479_v11 = vpop.f32.mrf.mxu1 }
 0x316   : > { %v869_v34 = vadd.f32 %v1479_v11, %v772_v1 }
 0x317   : > { %v860_v12 = vpop.f32.mrf.mxu1 }
 0x318   : > { %v893_v43 = vmax.f32 %v869_v34, 0.0  ;;  %v861_v44 = vadd.f32 %v860_v12, %v764_v38  ;;  %v913_v12 = vpop.permute.xlu0 %912 }
 0x319   : > { %v1480_v14 = vpop.f32.mrf.mxu1 }
 0x31a   : > { %v872_v25 = vadd.f32 %v1480_v14, %v776_v18  ;;  %v891_v47 = vmax.f32 %v861_v44, 0.0 }
 0x31b   : > { %v863_v16 = vpop.f32.mrf.mxu1 }
 0x31c   : > { %v894_v39 = vmax.f32 %v872_v25, 0.0  ;;  %v864_v41 = vadd.f32 %v863_v16, %v768_v31  ;;  %v1062_v25 = vpop.permute.xlu0 %1061 }
 0x31d   : > { %v1483_v17 = vpop.f32.mrf.mxu1 }
 0x31e   : > { %v885_v22 = vadd.f32 %v1483_v17, %v788_v9  ;;  %v900_v45 = vpack.c.bf16 %v894_v39, %v893_v43  ;;  %v892_v46 = vmax.f32 %v864_v41, 0.0 }
 0x31f   : > { %v876_v20 = vpop.f32.mrf.mxu1 }
 0x320   : > { %v877_v3 = vadd.f32 %v876_v20, %v780_v15  ;;  %v897_v28 = vmax.f32 %v885_v22, 0.0  ;;  %v899_v48 = vpack.c.bf16 %v892_v46, %v891_v47 }
 0x321   : > { %v1484_v2 = vpop.f32.mrf.mxu1 }
 0x322   : > { %v888_v23 = vadd.f32 %v1484_v2, %v792_v10  ;;  %v895_v35 = vmax.f32 %v877_v3, 0.0  ;;  %v1605_v2 = vld [vmem:[%s2045_s2 + $0x88] sm:$0xff]   ;;  %v1606_v3 = vld [vmem:[%s2045_s2 + $0x90] sm:$0xff]  }
 0x323   : > { %v879_v24 = vpop.f32.mrf.mxu1 }
 0x324   : > { %v898_v29 = vmax.f32 %v888_v23, 0.0  ;;  %v880_v30 = vadd.f32 %v879_v24, %v784_v13  ;;  %v1607_v23 = vld [vmem:[%s2045_s2 + $0x98] sm:$0xff]   ;;  %v1066_v24 = vpop.permute.xlu1 %1065 }
 0x326   : > { %v902_v36 = vpack.c.bf16 %v898_v29, %v897_v28  ;;  %v896_v37 = vmax.f32 %v880_v30, 0.0  ;;  %v1082_v30 = vpop.permute.xlu0 %1081 }
 0x328   : > { %v901_v42 = vpack.c.bf16 %v896_v37, %v895_v35  ;;  %1485 = vmatprep.subr.bf16.mxu0 %v902_v36  ;;  %v1078_v29 = vpop.permute.xlu1 %1077 }
 0x329   : > { %1486 = vmatpush3.bf16.msra.mxu0 %v902_v36 }
 0x32a   : > { %1487 = vmatprep.subr.bf16.mxu0 %v901_v42  ;;  %v1086_v37 = vpop.permute.xlu0 %1085 }
 0x32c   : > { %v1070_v36 = vpop.permute.xlu1 %1069 }
 0x32d   : > { %1488 = vmatpush3.bf16.msra.mxu0 %v901_v42 }
 0x32e   : > { %1489 = vmatprep.subr.bf16.mxu0 %v900_v45  ;;  %v1090_v47 = vpop.permute.xlu0 %1089 }
 0x330   : > { %v1074_v44 = vpop.permute.xlu1 %1073 }
 0x331   : > { %1490 = vmatpush3.bf16.msra.mxu0 %v900_v45 }
 0x332   : > { %1491 = vmatprep.subr.bf16.mxu0 %v899_v48 }
 0x335   : > { %1492 = vmatpush3.bf16.msra.mxu0 %v899_v48 }
 0x338   : > { %1494 = vmatmul.mubr.msk.bf16.vlgmr.msra.gmra.mxu0 %vm664_vm2, %v1601_v49 }
 0x339   : > { %1497 = vmatprep.mubr.msk.bf16.mxu0 %vm664_vm2, %v1602_v50 }
 0x340   : > { %1498 = vmatmul.mubr.msk.bf16.gmra.mxu0 %vm664_vm2, %v1603_v51 }
 0x3f8   : > { %v1495_v56 = vpop.f32.mrf.mxu0 }
 0x3f9   : > { %v1018_v8 = vadd.f32 %v1495_v56, %v921_v62 }
 0x3fa   : > { %v1009_v57 = vpop.f32.mrf.mxu0 }
 0x3fb   : > { %v1042_v16 = vmax.f32 %v1018_v8, 0.0  ;;  %v1010_v17 = vadd.f32 %v1009_v57, %v913_v12 }
 0x3fc   : > { %v1496_v33 = vpop.f32.mrf.mxu0 }
 0x3fd   : > { %v1021_v27 = vadd.f32 %v1496_v33, %v925_v26  ;;  %v1040_v22 = vmax.f32 %v1010_v17, 0.0 }
 0x3fe   : > { %v1012_v40 = vpop.f32.mrf.mxu0 }
 0x3ff   : > { %v1043_v13 = vmax.f32 %v1021_v27, 0.0  ;;  %v1013_v14 = vadd.f32 %v1012_v40, %v917_v7 }
 0x400   : > { %v1499_v60 = vpop.f32.mrf.mxu0 }
 0x401   : > { %v1034_v21 = vadd.f32 %v1499_v60, %v937_v54  ;;  %v1049_v18 = vpack.c.bf16 %v1043_v13, %v1042_v16  ;;  %v1041_v20 = vmax.f32 %v1013_v14, 0.0 }
 0x402   : > { %v1025_v61 = vpop.f32.mrf.mxu0 }
 0x403   : > { %v1026_v63 = vadd.f32 %v1025_v61, %v929_v55  ;;  %v1046_v4 = vmax.f32 %v1034_v21, 0.0  ;;  %v1048_v1 = vpack.c.bf16 %v1041_v20, %v1040_v22 }
 0x404   : > { %v1500_v32 = vpop.f32.mrf.mxu0 }
 0x405   : > { %v1037_v5 = vadd.f32 %v1500_v32, %v941_v59  ;;  %v1044_v9 = vmax.f32 %v1026_v63, 0.0 }
 0x406   : > { %v1028_v0 = vpop.f32.mrf.mxu0 }
 0x407   : > { %v1047_v19 = vmax.f32 %v1037_v5, 0.0  ;;  %v1029_v6 = vadd.f32 %v1028_v0, %v933_v58 }
 0x409   : > { %v1051_v10 = vpack.c.bf16 %v1047_v19, %v1046_v4  ;;  %v1045_v11 = vmax.f32 %v1029_v6, 0.0  ;;  %v1211_v19 = vstv %s1210_s24 }
 0x40b   : > { %v1050_v15 = vpack.c.bf16 %v1045_v11, %v1044_v9  ;;  %1501 = vmatprep.subr.bf16.mxu1 %v1051_v10 }
 0x40c   : > { %1502 = vmatpush3.bf16.msra.mxu1 %v1051_v10 }
 0x40d   : > { %1503 = vmatprep.subr.bf16.mxu1 %v1050_v15 }
 0x410   : > { %1504 = vmatpush3.bf16.msra.mxu1 %v1050_v15 }
 0x411   : > { %1505 = vmatprep.subr.bf16.mxu1 %v1049_v18 }
 0x414   : > { %1506 = vmatpush3.bf16.msra.mxu1 %v1049_v18 }
 0x415   : > { %1507 = vmatprep.subr.bf16.mxu1 %v1048_v1 }
 0x418   : > { %1508 = vmatpush3.bf16.msra.mxu1 %v1048_v1 }
 0x41b   : > { %1510 = vmatmul.mubr.msk.bf16.vlgmr.msra.gmra.mxu1 %vm664_vm2, %v1605_v2 }
 0x41c   : > { %1513 = vmatprep.mubr.msk.bf16.mxu1 %vm664_vm2, %v1606_v3 }
 0x423   : > { %1514 = vmatmul.mubr.msk.bf16.gmra.mxu1 %vm664_vm2, %v1607_v23 }
 0x4db   : > { %v1511_v28 = vpop.f32.mrf.mxu1 }
 0x4dc   : > { %v1167_v49 = vadd.f32 %v1511_v28, %v1070_v36 }
 0x4dd   : > { %v1158_v31 = vpop.f32.mrf.mxu1 }
 0x4de   : > { %v1159_v42 = vadd.f32 %v1158_v31, %v1062_v25  ;;  %v1191_v58 = vmax.f32 %v1167_v49, 0.0 }
 0x4df   : > { %v1512_v34 = vpop.f32.mrf.mxu1 }
 0x4e0   : > { %v1189_v53 = vmax.f32 %v1159_v42, 0.0  ;;  %v1170_v54 = vadd.f32 %v1512_v34, %v1074_v44 }
 0x4e1   : > { %v1161_v35 = vpop.f32.mrf.mxu1 }
 0x4e2   : > { %v1162_v45 = vadd.f32 %v1161_v35, %v1066_v24  ;;  %v1192_v60 = vmax.f32 %v1170_v54, 0.0 }
 0x4e3   : > { %v1515_v38 = vpop.f32.mrf.mxu1 }
 0x4e4   : > { %v1183_v46 = vadd.f32 %v1515_v38, %v1086_v37  ;;  %v1190_v55 = vmax.f32 %v1162_v45, 0.0 }
 0x4e5   : > { %v1174_v39 = vpop.f32.mrf.mxu1 }
 0x4e6   : > { %v1175_v41 = vadd.f32 %v1174_v39, %v1078_v29  ;;  %v1195_v56 = vmax.f32 %v1183_v46, 0.0 }
 0x4e7   : > { %v1516_v43 = vpop.f32.mrf.mxu1 }
 0x4e8   : > { %v1193_v50 = vmax.f32 %v1175_v41, 0.0  ;;  %v1186_v51 = vadd.f32 %v1516_v43, %v1090_v47  ;;  %v1199_v26 = vmul.f32 %v1195_v56, %v1191_v58 }
 0x4e9   : > { %v1177_v48 = vpop.f32.mrf.mxu1 }
 0x4ea   : > { %v1178_v52 = vadd.f32 %v1177_v48, %v1082_v30  ;;  %v1197_v33 = vmul.f32 %v1193_v50, %v1189_v53  ;;  %v1196_v59 = vmax.f32 %v1186_v51, 0.0 }
 0x4ec   : > { %v1194_v57 = vmax.f32 %v1178_v52, 0.0  ;;  %v1200_v21 = vmul.f32 %v1196_v59, %v1192_v60 }
 0x4ee   : > { %v1198_v40 = vmul.f32 %v1194_v57, %v1190_v55 }
 0x4f0   : > { %v1201_v61 = vadd.f32 %v1198_v40, %v1197_v33 }
 0x4f2   : > { %v1202_v62 = vadd.f32 %v1201_v61, %v1199_v26 }
 0x4f4   : > { %v1203_v32 = vadd.f32 %v1202_v62, %v1200_v21 }
 0x4f6   : > { %v1204_v63 = vrot.slane %v1203_v32, 4 }
 0x4f8   : > { %v1205_v5 = vadd.f32 %v1204_v63, %v1203_v32 }
 0x4fa   : > { %v1206_v0 = vrot.slane %v1205_v5, 2 }
 0x4fc   : > { %v1207_v27 = vadd.f32 %v1206_v0, %v1205_v5 }
 0x4fe   : > { %v1208_v4 = vrot.slane %v1207_v27, 1 }
 0x500   : > { %v1209_v6 = vadd.f32 %v1208_v4, %v1207_v27 }
 0x502   : > { %v1212_v7 = vadd.f32 %v1211_v19, %v1209_v6 }
 0x504   : > { %1213 = vst [vmem:[%s234_s26] sm:$0x1] %v1212_v7 }
 0x505   : > { %1621 = shalt.err (!%p1618_p3)
}
 0x506   : > { %s1622_s16 = scalar_lea.hbm %s1225_s9, 16  ;;  %s1626_s18 = scalar_lea.hbm %s2048_s5, 32 }
 0x507   : > { %p1623_p4 = scmp.ne.s32.totalorder %s1225_s9, %s1622_s16  ;;  %p1627_p9 = scmp.lt.s32.totalorder %s1225_s9, %s2048_s5 }
 0x508   : > { %p1628_p10 = scmp.lt.s32.totalorder %s1626_s18, %s1622_s16 }
 0x509   : > { %p1624_p7 = pnand %p1623_p4, %p1745_p5 }
 0x50a   : > { %p1629_p11 = por %p1628_p10, %p1627_p9 }
 0x50b   : > { %p1625_p8 = pneg %p1624_p7 }
 0x50d   : > { %p1630_p12 = pnand %p1629_p11, %p1625_p8 }
 0x50f   : > { %1633 = shalt.err (!%p1630_p12)
}
 0x510   : > { %1533 = dma.vmem_to_hbm [thread:$0]  (%p1745_p5), %s1228_s6, 16, %s1225_s9, %s1215_s11  }
 0x511 PF: > { %p1539_p13 = scmp.ge.s32.totalorder %s1668_s23, 2  ;;  %s1239_s24 = sand.u32 1, %s1656_s20  }
 0x512   : > { %s1240_s27 = scalar_lea.sflag [#allocation4], %s1239_s24 }
 0x513   : > { %p1536_p0 = pnand %p1539_p13, %p1749_p6 }
 0x515   : > { %p1537_p1 = pneg %p1536_p0 }
 0x517   : > { %1651 = dma.done.wait (%p1537_p1), %s1240_s27, 16  }
 0x518   : > { %1653 = vsyncadd (%p1537_p1), %s1240_s27, 4294967280  ;;  %p16_p2 = scmp.ge.s32.totalorder %s1733_s25, 4   ;;  %s2051_s20 = smov %s1660_s21 }
 0x519   : > { %s2052_s21 = smov %s1664_s22  ;;  %s2053_s22 = smov %s1743_s28 }
 0x51a   : > { %s2054_s23 = smov %s1733_s25  ;;  %18 = sbr.rel (!%p16_p2) target bundleno = 5 (0x5), region = 78 }
 0x51f   :  { %1244 = vsyncpa [#allocation4], 1 }
 0x520   :  { %1246 = vsyncpa [#allocation4 + $0x1], 1 }

</bundles_post_ra>
